<compile_context>
chip_gen: v5e
topology: v5e:2x2
jax: 0.10.0
libtpu: 0.0.40
codegen_flags: <defaults>
</compile_context>

<pallas_src>
from functools import partial

import jax
import jax.numpy as jnp
from jax.experimental import pallas as pl
from jax.experimental.pallas import tpu as pltpu


def _round_up(x, m):
    return ((x + m - 1) // m) * m


def _local_loss_kernel(lens_ref, words_ref, img_ref, sim_ref, attn_ref,
                       *, temp_attention, temp_similarity, aggregation, C_valid):
    # lens_ref  : (Bcap_pad,)      i32  SMEM  caption lengths (scalar-prefetched)
    # words_ref : (G, T, E)        f32  VMEM  caption group i, word-major
    # img_ref   : (1, E, C)        bf16 VMEM  image b features (spatial on lanes, 128-padded)
    # sim_ref   : (1, G, B)        f32        log caption-vs-image similarities for group i
    # attn_ref  : (G, T, C)                   attention map of caption i*G+g vs image i*G+g
    i = pl.program_id(0)            # caption-group index   ("parallel")
    b = pl.program_id(1)            # image index           ("arbitrary", innermost)

    G, T, E = words_ref.shape
    C = img_ref.shape[2]
    B = sim_ref.shape[2]

    temp_attn = jnp.float32(temp_attention)
    temp_sim = jnp.float32(temp_similarity)
    neg = jnp.float32(-1e30)
    eps = jnp.float32(1e-16)

    # ---- init the outputs resident across the image axis ----
    @pl.when(b == 0)
    def _():
        sim_ref[...] = jnp.zeros_like(sim_ref)
        attn_ref[...] = jnp.zeros_like(attn_ref)

    # ---- word mask from scalar-prefetched lengths (no mask tensor DMA) ----
    base = i * G
    g_iota = jax.lax.broadcasted_iota(jnp.int32, (G, 1, 1), 0)
    lens_col = jnp.zeros((G, 1, 1), jnp.int32)
    for g in range(G):                                   # G is small & static
        lens_col = lens_col + jnp.where(g_iota == g, lens_ref[base + g], 0)
    t_iota = jax.lax.broadcasted_iota(jnp.int32, (G, T, 1), 1)
    mask_f = (t_iota < lens_col).astype(jnp.float32)     # (G, T, 1)

    words = words_ref[...]                               # (G, T, E) f32
    w2d = words.reshape(G * T, E)                        # (G*T, E)
    img = img_ref[0]                                     # (E, C) bf16 - single layout

    # ---- attention scores: one (G*T, E) @ (E, C) MXU matmul ----
    scores = jnp.dot(w2d.astype(jnp.bfloat16), img,
                     preferred_element_type=jnp.float32)            # (G*T, C)
    scores = scores.reshape(G, T, C)
    scores = jnp.where(mask_f > 0, scores, neg)                      # drop padded words

    # word softmax (axis=1, per caption) == F.softmax(scores, dim=-1) in the reference
    s_max = jnp.max(scores, axis=1, keepdims=True)                   # (G, 1, C)
    e1 = jnp.exp(scores - s_max)
    attn_q = e1 / jnp.sum(e1, axis=1, keepdims=True)                 # exact divide

    # temperature-scaled spatial softmax (axis=2). attn_q in [0,1] -> exp needs no max shift.
    e2 = jnp.exp(attn_q * temp_attn)                                 # (G, T, C)
    if C_valid != C:                                                 # exclude spatial padding
        cmask = jax.lax.broadcasted_iota(jnp.int32, (1, 1, C), 2) < C_valid
        e2 = e2 * cmask.astype(jnp.float32)
    attn_c = e2 / jnp.sum(e2, axis=2, keepdims=True)                 # (G, T, C)

    # keep the attention map for the caption that matches image b
    for g in range(G):
        @pl.when(b == base + g)
        def _(g=g):
            attn_ref[g] = attn_c[g].astype(attn_ref.dtype)

    # ---- weighted context: (G*T, C) x (E, C)^T, contracting C (trans_b, MXU-native) ----
    wc = jax.lax.dot_general(attn_c.reshape(G * T, C).astype(jnp.bfloat16), img,
                             dimension_numbers=(((1,), (1,)), ((), ())),
                             preferred_element_type=jnp.float32)     # (G*T, E)

    # ---- per-word cosine similarity over E lanes ----
    num = jnp.sum(wc * w2d, axis=1, keepdims=True)                   # (G*T, 1)
    inv_w = jax.lax.rsqrt(jnp.maximum(jnp.sum(w2d * w2d, axis=1, keepdims=True), eps))
    inv_c = jax.lax.rsqrt(jnp.maximum(jnp.sum(wc * wc, axis=1, keepdims=True), eps))
    cos = (num * inv_w * inv_c).reshape(G, T, 1)

    word_sim = jnp.exp(cos * temp_sim) * mask_f                      # (G, T, 1)
    cap = jnp.sum(word_sim, axis=1)                                  # (G, 1)
    if aggregation == "mean":
        cap = cap / jnp.maximum(jnp.sum(mask_f, axis=1), 1.0)
    cap_log = jnp.log(cap)                                           # (G, 1)

    # accumulate column b of this caption group's similarity rows
    onehot_b = (jax.lax.broadcasted_iota(jnp.int32, (1, B), 1) == b).astype(jnp.float32)
    sim_ref[0] += cap_log * onehot_b                                 # (G, B)


def local_loss_pallas(image_features, word_embeddings, caption_lengths,
                      temp_attention=4.0, temp_similarity=5.0, temp_loss=10.0,
                      aggregation="sum", target_rows=256, attn_dtype=jnp.float32):
    B, E, H, W = image_features.shape
    Bcap, Ew, T = word_embeddings.shape
    assert Ew == E
    assert Bcap == B, "LocalLoss assumes one caption per image (B == Bcap)"

    C = H * W
    C_pad = _round_up(C, 128)           # lane-aligned spatial axis
    T_pad = _round_up(max(T, 1), 8)     # sublane-aligned word axis

    # Caption grouping: score matmul LHS has M = G*T_pad rows (MXU fill).
    G = max(1, min(Bcap, max(1, target_rows // T_pad)))
    Bcap_pad = _round_up(Bcap, G)
    num_groups = Bcap_pad // G

    # SINGLE resident image layout (B, E, C_pad) bf16; both matmuls consume it.
    img = image_features.reshape(B, E, C).astype(jnp.bfloat16)
    if C_pad != C:
        img = jnp.pad(img, ((0, 0), (0, 0), (0, C_pad - C)))

    words = jnp.transpose(word_embeddings, (0, 2, 1)).astype(jnp.float32)   # (Bcap, T, E)
    words = jnp.pad(words, ((0, Bcap_pad - Bcap), (0, T_pad - T), (0, 0)))

    lens = jnp.pad(caption_lengths.astype(jnp.int32), (0, Bcap_pad - Bcap),
                   constant_values=1)                                       # padded caps -> len 1

    kernel = partial(_local_loss_kernel,
                     temp_attention=temp_attention,
                     temp_similarity=temp_similarity,
                     aggregation=aggregation,
                     C_valid=C)

    # Scoped-VMEM budget sized from the actual resident/working buffers (+ headroom).
    attn_bytes = jnp.dtype(attn_dtype).itemsize
    est = (2 * G * T_pad * E * 4                 # words block (double-buffered)
           + 2 * E * C_pad * 2                   # image block bf16 (double-buffered)
           + 2 * G * B * 4                       # similarity rows
           + 2 * G * T_pad * C_pad * attn_bytes  # attention-map output block
           + 8 * G * T_pad * C_pad * 4           # in-kernel f32 working slabs
           + (2 << 20))
    vmem_limit = int(min(max(est, 16 << 20), 64 << 20))

    sim_rows, attn_all = pl.pallas_call(
        kernel,
        out_shape=(jax.ShapeDtypeStruct((num_groups, G, B), jnp.float32),
                   jax.ShapeDtypeStruct((Bcap_pad, T_pad, C_pad), attn_dtype)),
        grid_spec=pltpu.PrefetchScalarGridSpec(
            num_scalar_prefetch=1,              # caption lengths -> SMEM
            grid=(num_groups, B),               # (caption groups, images)
            in_specs=[
                pl.BlockSpec((G, T_pad, E), lambda i, b, lens_ref: (i, 0, 0)),
                pl.BlockSpec((1, E, C_pad), lambda i, b, lens_ref: (b, 0, 0)),
            ],
            out_specs=[
                pl.BlockSpec((1, G, B), lambda i, b, lens_ref: (i, 0, 0)),
                pl.BlockSpec((G, T_pad, C_pad), lambda i, b, lens_ref: (i, 0, 0)),
            ],
        ),
        compiler_params=pltpu.CompilerParams(
            dimension_semantics=("parallel", "arbitrary"),
            vmem_limit_bytes=vmem_limit),
    )(lens, words, img)

    # similarity_matrix[b, i] = sim_rows[i, b]
    sim = sim_rows.reshape(Bcap_pad, B)[:Bcap]          # (Bcap, B)
    sim_matrix = sim.T * temp_loss                      # (B, Bcap): rows = images

    labels = jnp.arange(B)

    def _cross_entropy(logits, lbl):
        lse = jax.nn.logsumexp(logits, axis=1)
        gold = jnp.take_along_axis(logits, lbl[:, None], axis=1)[:, 0]
        return jnp.mean(lse - gold)

    image_to_text_loss = _cross_entropy(sim_matrix, labels)
    text_to_image_loss = _cross_entropy(sim_matrix.T, labels)
    # attn_all: (Bcap_pad, T_pad, C_pad); rows [:caption_lengths[i]] and lanes [:H*W]
    # are meaningful (caller slices, like the PyTorch list of ragged maps).
    return image_to_text_loss, text_to_image_loss, attn_all


if __name__ == "__main__":
    key = jax.random.PRNGKey(0)
    B, E, H, W, T = 2, 32, 16, 16, 8
    k1, k2 = jax.random.split(key)

    image_features = jax.random.normal(k1, (B, E, H, W), dtype=jnp.float32)
    word_embeddings = jax.random.normal(k2, (B, E, T), dtype=jnp.float32)
    caption_lengths = jnp.array([5, 8], dtype=jnp.int32)

    i2t, t2i, attn_all = local_loss_pallas(
        image_features, word_embeddings, caption_lengths)
    jax.block_until_ready((i2t, t2i, attn_all))

    # Reconstruct the PyTorch-style list of attention maps (ragged word dim):
    # attention_maps[i] has shape (1, L_i, H, W).
    C = H * W
    lengths = [int(l) for l in caption_lengths]
    attention_maps = [attn_all[i, :L, :C].reshape(1, L, H, W)
                      for i, L in enumerate(lengths)]
    jax.block_until_ready(attention_maps)

    assert bool(jnp.isfinite(i2t)) and bool(jnp.isfinite(t2i))
    print("KERNEL_OK")
</pallas_src>

<mosaic_0001>
module attributes {stable_mosaic.version = 11 : i64} {
  func.func @_local_loss_kernel(%arg0: i32, %arg1: i32, %arg2: memref<2xi32, #tpu.memory_space<smem>>, %arg3: memref<2x8x32xf32, #tpu.memory_space<vmem>>, %arg4: memref<1x32x256xbf16, #tpu.memory_space<vmem>>, %arg5: memref<1x2x2xf32, #tpu.memory_space<vmem>>, %arg6: memref<2x8x256xf32, #tpu.memory_space<vmem>>) attributes {dimension_semantics = [#tpu.dimension_semantics<parallel>, #tpu.dimension_semantics<arbitrary>], iteration_bounds = array<i64: 1, 2>, scalar_prefetch = 1 : i64, scratch_operands = 0 : i64, tpu.core_type = #tpu.core_type<tc>, window_params = [{transform_indices = @transform_0, window_bounds = array<i64: 2, 8, 32>}, {transform_indices = @transform_1, window_bounds = array<i64: 1, 32, 256>}, {transform_indices = @transform_2, window_bounds = array<i64: 1, 2, 2>}, {transform_indices = @transform_3, window_bounds = array<i64: 2, 8, 256>}]} {
    %c0_i32 = arith.constant 0 : i32
    %0 = arith.cmpi eq, %arg1, %c0_i32 : i32
    %1 = arith.extui %0 : i1 to i32
    %c0_i32_0 = arith.constant 0 : i32
    %2 = arith.cmpi ne, %1, %c0_i32_0 : i32
    scf.if %2 {
      %cst_36 = arith.constant 0.000000e+00 : f32
      %107 = vector.broadcast %cst_36 : f32 to vector<1x2x2xf32>
      %c0_37 = arith.constant 0 : index
      %c0_38 = arith.constant 0 : index
      %c0_39 = arith.constant 0 : index
      %108 = vector.load %arg5[%c0_37, %c0_38, %c0_39] : memref<1x2x2xf32, #tpu.memory_space<vmem>>, vector<1x2x2xf32>
      tpu.vector_store %arg5[%c0_37, %c0_38, %c0_39], %107 {strides = array<i32>} : memref<1x2x2xf32, #tpu.memory_space<vmem>>, vector<1x2x2xf32>,
      %cst_40 = arith.constant 0.000000e+00 : f32
      %109 = vector.broadcast %cst_40 : f32 to vector<2x8x256xf32>
      %c0_41 = arith.constant 0 : index
      %c0_42 = arith.constant 0 : index
      %c0_43 = arith.constant 0 : index
      %110 = vector.load %arg6[%c0_41, %c0_42, %c0_43] : memref<2x8x256xf32, #tpu.memory_space<vmem>>, vector<2x8x256xf32>
      tpu.vector_store %arg6[%c0_41, %c0_42, %c0_43], %109 {strides = array<i32>} : memref<2x8x256xf32, #tpu.memory_space<vmem>>, vector<2x8x256xf32>,
    } else {
    }
    %c2_i32 = arith.constant 2 : i32
    %3 = arith.muli %arg0, %c2_i32 : i32
    %4 = tpu.iota {dimensions = array<i32: 0>} : vector<2x1x1xi32>
    %c0_i32_1 = arith.constant 0 : i32
    %5 = vector.broadcast %c0_i32_1 : i32 to vector<2x1x1xi32>
    %c0_i32_2 = arith.constant 0 : i32
    %6 = vector.broadcast %c0_i32_2 : i32 to vector<2x1x1xi32>
    %7 = arith.cmpi eq, %4, %6 : vector<2x1x1xi32>
    %c0_i32_3 = arith.constant 0 : i32
    %8 = arith.addi %3, %c0_i32_3 : i32
    %9 = arith.index_cast %8 : i32 to index
    %10 = memref.load %arg2[%9] : memref<2xi32, #tpu.memory_space<smem>>
    %c0_i32_4 = arith.constant 0 : i32
    %11 = vector.broadcast %10 : i32 to vector<2x1x1xi32>
    %12 = vector.broadcast %c0_i32_4 : i32 to vector<2x1x1xi32>
    %13 = arith.select %7, %11, %12 : vector<2x1x1xi1>, vector<2x1x1xi32>
    %14 = arith.addi %5, %13 : vector<2x1x1xi32>
    %c1_i32 = arith.constant 1 : i32
    %15 = vector.broadcast %c1_i32 : i32 to vector<2x1x1xi32>
    %16 = arith.cmpi eq, %4, %15 : vector<2x1x1xi32>
    %c1_i32_5 = arith.constant 1 : i32
    %17 = arith.addi %3, %c1_i32_5 : i32
    %18 = arith.index_cast %17 : i32 to index
    %19 = memref.load %arg2[%18] : memref<2xi32, #tpu.memory_space<smem>>
    %c0_i32_6 = arith.constant 0 : i32
    %20 = vector.broadcast %19 : i32 to vector<2x1x1xi32>
    %21 = vector.broadcast %c0_i32_6 : i32 to vector<2x1x1xi32>
    %22 = arith.select %16, %20, %21 : vector<2x1x1xi1>, vector<2x1x1xi32>
    %23 = arith.addi %14, %22 : vector<2x1x1xi32>
    %24 = tpu.iota {dimensions = array<i32: 1>} : vector<2x8x1xi32>
    %25 = vector.broadcast %23 : vector<2x1x1xi32> to vector<2x8x1xi32>
    %26 = arith.cmpi slt, %24, %25 : vector<2x8x1xi32>
    %27 = arith.extui %26 : vector<2x8x1xi1> to vector<2x8x1xi32>
    %28 = arith.sitofp %27 : vector<2x8x1xi32> to vector<2x8x1xf32>
    %c0 = arith.constant 0 : index
    %c0_7 = arith.constant 0 : index
    %c0_8 = arith.constant 0 : index
    %29 = vector.load %arg3[%c0, %c0_7, %c0_8] : memref<2x8x32xf32, #tpu.memory_space<vmem>>, vector<2x8x32xf32>
    %30 = vector.shape_cast %29 : vector<2x8x32xf32> to vector<16x32xf32>
    %c0_9 = arith.constant 0 : index
    %c0_10 = arith.constant 0 : index
    %c0_11 = arith.constant 0 : index
    %31 = vector.load %arg4[%c0_9, %c0_10, %c0_11] : memref<1x32x256xbf16, #tpu.memory_space<vmem>>, vector<1x32x256xbf16>
    %32 = vector.shape_cast %31 : vector<1x32x256xbf16> to vector<32x256xbf16>
    %33 = arith.truncf %30 : vector<16x32xf32> to vector<16x32xbf16>
    %cst = arith.constant dense<0.000000e+00> : vector<16x256xf32>
    %34 = tpu.matmul %33, %32, %cst {dimension_numbers = #tpu.dot_dimension_numbers<[1], [0], [0], [1], [0, 0, 1, 1], [], []>} : vector<16x32xbf16>, vector<32x256xbf16>, vector<16x256xf32> -> vector<16x256xf32>
    %35 = vector.shape_cast %34 : vector<16x256xf32> to vector<2x8x256xf32>
    %cst_12 = arith.constant 0.000000e+00 : f32
    %36 = vector.broadcast %cst_12 : f32 to vector<2x8x1xf32>
    %37 = arith.cmpf ogt, %28, %36 : vector<2x8x1xf32>
    %cst_13 = arith.constant -1.000000e+30 : f32
    %38 = vector.shape_cast %37 : vector<2x8x1xi1> to vector<2x8x1xi1>
    %39 = vector.broadcast %38 : vector<2x8x1xi1> to vector<2x8x256xi1>
    %40 = vector.broadcast %cst_13 : f32 to vector<2x8x256xf32>
    %41 = arith.select %39, %35, %40 : vector<2x8x256xi1>, vector<2x8x256xf32>
    %cst_14 = arith.constant dense<0xFF800000> : vector<2x256xf32>
    %42 = vector.multi_reduction <maximumf>, %41, %cst_14 [1] : vector<2x8x256xf32> to vector<2x256xf32>
    %43 = vector.shape_cast %42 : vector<2x256xf32> to vector<2x1x256xf32>
    %44 = vector.broadcast %43 : vector<2x1x256xf32> to vector<2x8x256xf32>
    %45 = arith.subf %41, %44 : vector<2x8x256xf32>
    %46 = math.exp %45 : vector<2x8x256xf32>
    %cst_15 = arith.constant dense<0.000000e+00> : vector<2x256xf32>
    %47 = vector.multi_reduction <add>, %46, %cst_15 [1] : vector<2x8x256xf32> to vector<2x256xf32>
    %48 = vector.shape_cast %47 : vector<2x256xf32> to vector<2x1x256xf32>
    %49 = vector.broadcast %48 : vector<2x1x256xf32> to vector<2x8x256xf32>
    %50 = arith.divf %46, %49 : vector<2x8x256xf32>
    %cst_16 = arith.constant 4.000000e+00 : f32
    %51 = vector.broadcast %cst_16 : f32 to vector<2x8x256xf32>
    %52 = arith.mulf %50, %51 : vector<2x8x256xf32>
    %53 = math.exp %52 : vector<2x8x256xf32>
    %cst_17 = arith.constant dense<0.000000e+00> : vector<2x8xf32>
    %54 = vector.multi_reduction <add>, %53, %cst_17 [2] : vector<2x8x256xf32> to vector<2x8xf32>
    %55 = vector.shape_cast %54 : vector<2x8xf32> to vector<2x8x1xf32>
    %56 = vector.broadcast %55 : vector<2x8x1xf32> to vector<2x8x256xf32>
    %57 = arith.divf %53, %56 : vector<2x8x256xf32>
    %c0_i32_18 = arith.constant 0 : i32
    %58 = arith.addi %3, %c0_i32_18 : i32
    %59 = arith.cmpi eq, %arg1, %58 : i32
    %60 = arith.extui %59 : i1 to i32
    %c0_i32_19 = arith.constant 0 : i32
    %61 = arith.cmpi ne, %60, %c0_i32_19 : i32
    scf.if %61 {
      %107 = vector.extract_strided_slice %57 {offsets = [0, 0, 0], sizes = [1, 8, 256], strides = [1, 1, 1]} : vector<2x8x256xf32> to vector<1x8x256xf32>
      %108 = vector.shape_cast %107 : vector<1x8x256xf32> to vector<8x256xf32>
      %c0_36 = arith.constant 0 : index
      %c0_37 = arith.constant 0 : index
      %c0_38 = arith.constant 0 : index
      %109 = vector.load %arg6[%c0_36, %c0_37, %c0_38] : memref<2x8x256xf32, #tpu.memory_space<vmem>>, vector<1x8x256xf32>
      %110 = vector.shape_cast %109 : vector<1x8x256xf32> to vector<8x256xf32>
      %111 = vector.shape_cast %108 : vector<8x256xf32> to vector<1x8x256xf32>
      tpu.vector_store %arg6[%c0_36, %c0_37, %c0_38], %111 {strides = array<i32>} : memref<2x8x256xf32, #tpu.memory_space<vmem>>, vector<1x8x256xf32>,
    } else {
    }
    %c1_i32_20 = arith.constant 1 : i32
    %62 = arith.addi %3, %c1_i32_20 : i32
    %63 = arith.cmpi eq, %arg1, %62 : i32
    %64 = arith.extui %63 : i1 to i32
    %c0_i32_21 = arith.constant 0 : i32
    %65 = arith.cmpi ne, %64, %c0_i32_21 : i32
    scf.if %65 {
      %107 = vector.extract_strided_slice %57 {offsets = [1, 0, 0], sizes = [1, 8, 256], strides = [1, 1, 1]} : vector<2x8x256xf32> to vector<1x8x256xf32>
      %108 = vector.shape_cast %107 : vector<1x8x256xf32> to vector<8x256xf32>
      %c1 = arith.constant 1 : index
      %c0_36 = arith.constant 0 : index
      %c0_37 = arith.constant 0 : index
      %109 = vector.load %arg6[%c1, %c0_36, %c0_37] : memref<2x8x256xf32, #tpu.memory_space<vmem>>, vector<1x8x256xf32>
      %110 = vector.shape_cast %109 : vector<1x8x256xf32> to vector<8x256xf32>
      %111 = vector.shape_cast %108 : vector<8x256xf32> to vector<1x8x256xf32>
      tpu.vector_store %arg6[%c1, %c0_36, %c0_37], %111 {strides = array<i32>} : memref<2x8x256xf32, #tpu.memory_space<vmem>>, vector<1x8x256xf32>,
    } else {
    }
    %66 = vector.shape_cast %57 : vector<2x8x256xf32> to vector<16x256xf32>
    %67 = arith.truncf %66 : vector<16x256xf32> to vector<16x256xbf16>
    %cst_22 = arith.constant dense<0.000000e+00> : vector<16x32xf32>
    %68 = tpu.matmul %67, %32, %cst_22 {dimension_numbers = #tpu.dot_dimension_numbers<[1], [1], [0], [0], [0, 0, 1, 0], [], []>} : vector<16x256xbf16>, vector<32x256xbf16>, vector<16x32xf32> -> vector<16x32xf32>
    %69 = arith.mulf %68, %30 : vector<16x32xf32>
    %cst_23 = arith.constant dense<0.000000e+00> : vector<16xf32>
    %70 = vector.multi_reduction <add>, %69, %cst_23 [1] : vector<16x32xf32> to vector<16xf32>
    %71 = vector.shape_cast %70 : vector<16xf32> to vector<16x1xf32>
    %72 = arith.mulf %30, %30 : vector<16x32xf32>
    %cst_24 = arith.constant dense<0.000000e+00> : vector<16xf32>
    %73 = vector.multi_reduction <add>, %72, %cst_24 [1] : vector<16x32xf32> to vector<16xf32>
    %74 = vector.shape_cast %73 : vector<16xf32> to vector<16x1xf32>
    %cst_25 = arith.constant 1.000000e-16 : f32
    %75 = vector.broadcast %cst_25 : f32 to vector<16x1xf32>
    %76 = arith.maximumf %74, %75 : vector<16x1xf32>
    %77 = math.rsqrt %76 : vector<16x1xf32>
    %78 = arith.mulf %68, %68 : vector<16x32xf32>
    %cst_26 = arith.constant dense<0.000000e+00> : vector<16xf32>
    %79 = vector.multi_reduction <add>, %78, %cst_26 [1] : vector<16x32xf32> to vector<16xf32>
    %80 = vector.shape_cast %79 : vector<16xf32> to vector<16x1xf32>
    %cst_27 = arith.constant 1.000000e-16 : f32
    %81 = vector.broadcast %cst_27 : f32 to vector<16x1xf32>
    %82 = arith.maximumf %80, %81 : vector<16x1xf32>
    %83 = math.rsqrt %82 : vector<16x1xf32>
    %84 = arith.mulf %71, %77 : vector<16x1xf32>
    %85 = arith.mulf %84, %83 : vector<16x1xf32>
    %86 = vector.shape_cast %85 : vector<16x1xf32> to vector<2x8x1xf32>
    %cst_28 = arith.constant 5.000000e+00 : f32
    %87 = vector.broadcast %cst_28 : f32 to vector<2x8x1xf32>
    %88 = arith.mulf %86, %87 : vector<2x8x1xf32>
    %89 = math.exp %88 : vector<2x8x1xf32>
    %90 = arith.mulf %89, %28 : vector<2x8x1xf32>
    %cst_29 = arith.constant dense<0.000000e+00> : vector<2x1xf32>
    %91 = vector.multi_reduction <add>, %90, %cst_29 [1] : vector<2x8x1xf32> to vector<2x1xf32>
    %92 = math.log %91 : vector<2x1xf32>
    %93 = tpu.iota {dimensions = array<i32: 1>} : vector<1x2xi32>
    %94 = vector.broadcast %arg1 : i32 to vector<1x2xi32>
    %95 = arith.cmpi eq, %93, %94 : vector<1x2xi32>
    %96 = arith.extui %95 : vector<1x2xi1> to vector<1x2xi32>
    %97 = arith.sitofp %96 : vector<1x2xi32> to vector<1x2xf32>
    %c0_30 = arith.constant 0 : index
    %c0_31 = arith.constant 0 : index
    %c0_32 = arith.constant 0 : index
    %98 = vector.load %arg5[%c0_30, %c0_31, %c0_32] : memref<1x2x2xf32, #tpu.memory_space<vmem>>, vector<1x2x2xf32>
    %99 = vector.shape_cast %98 : vector<1x2x2xf32> to vector<2x2xf32>
    %100 = vector.broadcast %92 : vector<2x1xf32> to vector<2x2xf32>
    %101 = vector.broadcast %97 : vector<1x2xf32> to vector<2x2xf32>
    %102 = arith.mulf %100, %101 : vector<2x2xf32>
    %103 = arith.addf %99, %102 : vector<2x2xf32>
    %c0_33 = arith.constant 0 : index
    %c0_34 = arith.constant 0 : index
    %c0_35 = arith.constant 0 : index
    %104 = vector.load %arg5[%c0_33, %c0_34, %c0_35] : memref<1x2x2xf32, #tpu.memory_space<vmem>>, vector<1x2x2xf32>
    %105 = vector.shape_cast %104 : vector<1x2x2xf32> to vector<2x2xf32>
    %106 = vector.shape_cast %103 : vector<2x2xf32> to vector<1x2x2xf32>
    tpu.vector_store %arg5[%c0_33, %c0_34, %c0_35], %106 {strides = array<i32>} : memref<1x2x2xf32, #tpu.memory_space<vmem>>, vector<1x2x2xf32>,
    return
  }
  func.func @transform_0(%arg0: i32, %arg1: i32, %arg2: memref<2xi32, #tpu.memory_space<smem>>) -> (i32, i32, i32) {
    %c0_i32 = arith.constant 0 : i32
    %c0_i32_0 = arith.constant 0 : i32
    %c0_i32_1 = arith.constant 0 : i32
    return %arg0, %c0_i32, %c0_i32_0 : i32, i32, i32
  }
  func.func @transform_1(%arg0: i32, %arg1: i32, %arg2: memref<2xi32, #tpu.memory_space<smem>>) -> (i32, i32, i32) {
    %c0_i32 = arith.constant 0 : i32
    %c0_i32_0 = arith.constant 0 : i32
    %c0_i32_1 = arith.constant 0 : i32
    return %arg1, %c0_i32, %c0_i32_0 : i32, i32, i32
  }
  func.func @transform_2(%arg0: i32, %arg1: i32, %arg2: memref<2xi32, #tpu.memory_space<smem>>) -> (i32, i32, i32) {
    %c0_i32 = arith.constant 0 : i32
    %c0_i32_0 = arith.constant 0 : i32
    %c0_i32_1 = arith.constant 0 : i32
    return %arg0, %c0_i32, %c0_i32_0 : i32, i32, i32
  }
  func.func @transform_3(%arg0: i32, %arg1: i32, %arg2: memref<2xi32, #tpu.memory_space<smem>>) -> (i32, i32, i32) {
    %c0_i32 = arith.constant 0 : i32
    %c0_i32_0 = arith.constant 0 : i32
    %c0_i32_1 = arith.constant 0 : i32
    return %arg0, %c0_i32, %c0_i32_0 : i32, i32, i32
  }
}

</mosaic_0001>

<bundles_post_ra>
// kernel: tpu_custom_call.1
= control target key start
LH: loop header
LB: loop body
LE: loop exit
PB: predicated region body
PF: predicated region fallthrough
CT: control target
= control target key end

     0   :  { %s1146_s18 = smov [#allocation3]   ;;  %s1399_s0 = inlined_call_operand.hbm [shape: s32[2], index: 0, kind: input, shape index: {}]   ;;  %s1400_s1 = inlined_call_operand.hbm [shape: f32[2,8,32], index: 1, kind: input, shape index: {}]   ;;  %s1401_s2 = inlined_call_operand.hbm [shape: bf16[2,32,256], index: 2, kind: input, shape index: {}]   ;;  %s1402_s3 = inlined_call_operand.hbm [shape: f32[1,2,2], index: 3, kind: output, shape index: {0}]   ;;  %s1403_s4 = inlined_call_operand.hbm [shape: f32[2,8,256], index: 4, kind: output, shape index: {1}]  }
   0x1   :  { %s11_s17 = sshll.u32 %s1399_s0, 4  ;;  %s12_s17 = int_to_ptr.hbm [resolvable:$true] %s11_s17 }
   0x2   :  { %14 = dma.hbm_to_smem %s12_s17, 16, %s1146_s18, [#allocation2] }
   0x3   :  { %1104 = dma.done.wait [#allocation2], 16 }
   0x4   :  { %1105 = vsyncadd [#allocation2], 4294967280 }
   0x5   :  { %17 = sfence }
   0x6   :  { %18 = vsyncpa [#allocation5], 0 }
   0x7   :  { %19 = vsyncpa [#allocation8], 0 }
   0x8   :  { %21 = vsyncpa [#allocation8 + $0x1], 0 }
   0x9   :  { %22 = vsyncpa [#allocation6], 0 }
   0xa   :  { %23 = vsyncpa [#allocation11], 0  ;;  %s1184_s19 = smov 0   ;;  %s1186_s20 = smov 0  }
   0xb   :  { %s1188_s21 = smov 0   ;;  %s1190_s22 = smov 0  }
   0xc   :  { %s1192_s0 = smov 0   ;;  %s1194_s23 = smov 0  }
   0xd LB: > { %s775_s24 = sadd.s32 4294967295, %s1144_s23   ;;  %p87_p0 = scmp.ne.s32.totalorder %s1128_s20, %s1124_s19  ;;  %s1144_s23 = sphi %s1194_s23, %s29_s23   ;;  %s1140_s0 = sphi %s1192_s0, %s1413_s0   ;;  %s1136_s22 = sphi %s1190_s22, %s1412_s22   ;;  %s1132_s21 = sphi %s1188_s21, %s1411_s21   ;;  %s1128_s20 = sphi %s1186_s20, %s1410_s20   ;;  %s1124_s19 = sphi %s1184_s19, %s1409_s19  }
   0xe   : > { %p1216_p1 = scmp.eq.s32.totalorder %s775_s24, 0  ;;  %p776_p2 = scmp.ge.s32.totalorder %s1144_s23, 1 }
   0xf   : > { %p150_p3 = scmp.lt.s32.totalorder %s1144_s23, 3  ;;  %s164_s29 = sshll.u32 %s1400_s1, 4  ;;  %s165_s29 = int_to_ptr.hbm [resolvable:$true] %s164_s29 }
  0x10   : > { %p1224_p4 = por %p1216_p1, %p87_p0  ;;  %s1147_s5 = smov [#allocation4]  }
  0x11   : > { %p1231_p5 = pnand %p776_p2, %p150_p3  ;;  %s166_s6 = sshll.u32 %s1147_s5, 4  ;;  %s167_s6 = int_to_ptr.vmem [resolvable:$true] %s166_s6 }
  0x12   : > { %s1148_s7 = smov 128   ;;  %s1149_s8 = smov 8  }
  0x13   : > { %p835_p6 = pneg %p1231_p5  ;;  %s38_s9 = sadd.s32 1, %s1140_s0 }
  0x14   : > { %p39_p8 = scmp.ge.s32.totalorder %s38_s9, 2  ;;  %p81_p9 = scmp.ne.s32.totalorder %s1132_s21, %s1128_s20 }
  0x15   : > { %p836_p7 = pnand %p835_p6, %p1216_p1  ;;  %p82_p10 = scmp.eq.s32.totalorder %s1144_s23, 0 }
  0x16   : > { %s1415_s9 = smov (%p39_p8, %s38_s9), 0  ;;  %s74_s10 = sadd.s32 1, %s1132_s21 }
  0x17   : > { %838 = dma.hbm_to_vmem [thread:$0]  (!%p836_p7), %s165_s29, 256, %s167_s6, [#allocation5], %s1148_s7, %s1148_s7, %s1149_s8  }
  0x18   : > { %p1246_p11 = por %p82_p10, %p81_p9  ;;  %s71_s12 = ssub.s32 %s1140_s0, %s1415_s9 }
  0x19   : > { %s180_s13 = sand.u32 1, %s1132_s21   ;;  %p72_p12 = scmp.eq.s32.totalorder %s71_s12, 0 }
  0x1a   : > { %p844_p13 = scmp.lt.s32.totalorder %s1144_s23, 2  ;;  %s779_s14 = sshll.u32 %s180_s13, 5 }
  0x1b   : > { %s816_s15 = sshll.u32 %s1140_s0, 5  ;;  %s184_s28 = scalar_lea.vmem [#allocation7], %s779_s14 }
  0x1c   : > { %s1256_s16 = scalar_select %p72_p12, %s1132_s21, %s74_s10  }
  0x1d   : > { %s189_s19 = scalar_lea.hbm %s1401_s2, %s816_s15  ;;  %s192_s29 = sshll.u32 %s184_s28, 4  ;;  %s193_s29 = int_to_ptr.vmem [resolvable:$true] %s192_s29 }
  0x1e   : > { %s190_s27 = sshll.u32 %s189_s19, 4  ;;  %p840_p0 = pnand %p844_p13, %p1246_p11  ;;  %s191_s27 = int_to_ptr.hbm [resolvable:$true] %s190_s27 }
  0x1f   : > { %s181_s5 = scalar_lea.sflag [#allocation8], %s180_s13  ;;  %204 = sbr.rel (%p1231_p5) target bundleno = 763 (0x2fb), region = 28 }
  0x20   : > { %842 = dma.hbm_to_vmem [thread:$0]  (!%p840_p0), %s191_s27, 512, %s193_s29, %s181_s5, %s1148_s7, %s1148_s7, %s1149_s8  }
  0x24   : > { %1107 = dma.done.wait (%p1216_p1), [#allocation5], 256  }
  0x25   : > { %1109 = vsyncadd (%p1216_p1), [#allocation5], 4294967040  ;;  %s211_s6 = sand.u32 1, %s1128_s20  }
  0x26   : > { %s784_s10 = sshll.u32 %s211_s6, 5  ;;  %s212_s12 = scalar_lea.sflag [#allocation8], %s211_s6 }
  0x27   : > { %s215_s14 = scalar_lea.vmem [#allocation7], %s784_s10 }
  0x28   : > { %1111 = dma.done.wait (%p1224_p4), %s212_s12, 512  }
  0x29   : > { %1113 = vsyncadd (%p1224_p4), %s212_s12, 4294966784  ;;  %p785_p2 = scmp.ne.s32.totalorder %s1136_s22, 0 }
  0x2b   : > { %240 = sbr.rel (%p785_p2) target bundleno = 54 (0x36), region = 40 }
  0x30   : > { %vm241_vm0 = vcmask 9216   ;;  %v1150_v0 = vmov 0.0  }
  0x31   : > { %242 = vst.msk [vmem:[#allocation9] sm:$0x3] %vm241_vm0, %v1150_v0 }
  0x32   : > { %243 = vst [vmem:[#allocation10] sm:$0xff] %v1150_v0 }
  0x33   : > { %244 = vst [vmem:[#allocation10 + $0x8] sm:$0xff] %v1150_v0 }
  0x34   : > { %245 = vst [vmem:[#allocation10 + $0x10] sm:$0xff] %v1150_v0 }
  0x35   : > { %246 = vst [vmem:[#allocation10 + $0x18] sm:$0xff] %v1150_v0 }
  0x36 PF: > { %v799_v1 = vld [vmem:[%s215_s14 + $0x10] sm:$0xf]  ;;  %v820_v2 = vld [vmem:[%s215_s14 + $0x14] sm:$0xf0]  ;;  %v819_v3 = vld [vmem:[%s215_s14 + $0x14] sm:$0xf]  ;;  %v253_v16 = vlaneseq }
  0x37   : > { %v1277_v4 = vor.u32 %v820_v2, %v799_v1  ;;  %v801_v5 = vld [vmem:[%s215_s14 + $0x18] sm:$0xf0]  ;;  %v791_v6 = vld [vmem:[%s215_s14] sm:$0xf]  ;;  %v818_v7 = vld [vmem:[%s215_s14 + $0x4] sm:$0xf0] }
  0x38   : > { %v1279_v8 = vor.u32 %v819_v3, %v801_v5  ;;  %v817_v9 = vld [vmem:[%s215_s14 + $0x4] sm:$0xf]  ;;  %v793_v10 = vld [vmem:[%s215_s14 + $0x8] sm:$0xf0]  ;;  %v1282_v11 = vor.u32 %v818_v7, %v791_v6  ;;  %v1284_v12 = vld [vmem:[#allocation4] sm:$0xff]  ;;  %vm288_vm1 = vcmask 261120  }
  0x39   : > { %298 = vmatpush.bf16.msra.mxu0 %v1277_v4  ;;  %v1286_v13 = vld [vmem:[#allocation4 + $0x8] sm:$0xff]  ;;  %v1289_v14 = vor.u32 %v817_v9, %v793_v10  ;;  %s248_s25 = sld [smem:[#allocation3]]  ;;  %v254_v17 = vshrl.u32 %v253_v16, 7  ;;  %v1151_v19 = vmov 0.0  }
  0x3a   : > { %312 = vmatpush.bf16.msra.mxu1 %v1279_v8  ;;  %v267_v15 = vpack.c.bf16 %v1286_v13, %v1284_v12  ;;  %s786_s26 = sld [smem:[#allocation3 + $0x1]] }
  0x3d   : > { %299 = vmatpush.bf16.msra.mxu0 %v1282_v11 }
  0x3e   : > { %313 = vmatpush.bf16.msra.mxu1 %v1289_v14 }
  0x3f   : > { %v249_v18 = vstv %s248_s25 }
  0x40   : > { %805 = vmatmul.msk.bf16.vlgmr.msra.gmra.mxu0 %vm288_vm1, %v267_v15  ;;  %vm255_vm2 = vcmp.lt.s32.totalorder %v254_v17, %v249_v18  ;;  %v252_v21 = vstv %s786_s26 }
  0x41   : > { %806 = vmatmul.msk.bf16.vlgmr.msra.gmra.mxu1 %vm288_vm1, %v267_v15  ;;  %v1299_v20 = vsel %vm255_vm2, 1.0, %v1151_v19  ;;  %vm256_vm4 = vcmp.lt.s32.totalorder %v254_v17, %v252_v21 }
  0x42   : > { %vm320_vm3 = vcmp.gt.f32.partialorder %v1299_v20, 0.0  ;;  %v1303_v28 = vsel %vm256_vm4, 1.0, %v1151_v19 }
  0x43   : > { %vm321_vm5 = vcmp.gt.f32.partialorder %v1303_v28, 0.0 }
  0xbd   : > { %v301_v22 = vpop.f32.mrf.mxu0 }
  0xbe   : > { %v326_v23 = vsel %vm320_vm3, %v301_v22, -1e+30  ;;  %v315_v24 = vpop.f32.mrf.mxu1 }
  0xbf   : > { %v330_v25 = vrot.slane %v326_v23, 4  ;;  %v327_v26 = vsel %vm320_vm3, %v315_v24, -1e+30 }
  0xc0   : > { %v336_v27 = vrot.slane %v327_v26, 4 }
  0xc1   : > { %v331_v29 = vmax.f32 %v326_v23, %v330_v25 }
  0xc2   : > { %v337_v30 = vmax.f32 %v327_v26, %v336_v27 }
  0xc3   : > { %v332_v31 = vrot.slane %v331_v29, 2 }
  0xc4   : > { %v338_v32 = vrot.slane %v337_v30, 2 }
  0xc5   : > { %v333_v33 = vmax.f32 %v331_v29, %v332_v31  ;;  %v303_v34 = vpop.f32.mrf.mxu0 }
  0xc6   : > { %v339_v35 = vmax.f32 %v337_v30, %v338_v32  ;;  %v328_v36 = vsel %vm321_vm5, %v303_v34, -1e+30  ;;  %v317_v37 = vpop.f32.mrf.mxu1 }
  0xc7   : > { %v334_v38 = vrot.slane %v333_v33, 1  ;;  %v342_v39 = vrot.slane %v328_v36, 4  ;;  %v329_v40 = vsel %vm321_vm5, %v317_v37, -1e+30 }
  0xc8   : > { %v340_v41 = vrot.slane %v339_v35, 1  ;;  %v348_v42 = vrot.slane %v329_v40, 4 }
  0xc9   : > { %v335_v43 = vmax.f32 %v333_v33, %v334_v38  ;;  %v343_v44 = vmax.f32 %v328_v36, %v342_v39 }
  0xca   : > { %v341_v45 = vmax.f32 %v339_v35, %v340_v41  ;;  %v349_v46 = vmax.f32 %v329_v40, %v348_v42 }
  0xcb   : > { %v354_v47 = vsub.f32 %v326_v23, %v335_v43  ;;  %v344_v48 = vrot.slane %v343_v44, 2 }
  0xcc   : > { %v355_v49 = vsub.f32 %v327_v26, %v341_v45  ;;  %v350_v50 = vrot.slane %v349_v46, 2 }
  0xcd   : > { %v358_v51 = vmul.f32 1.442695, %v354_v47  ;;  %v345_v52 = vmax.f32 %v343_v44, %v344_v48 }
  0xce   : > { %v360_v53 = vmul.f32 1.442695, %v355_v49  ;;  %v351_v54 = vmax.f32 %v349_v46, %v350_v50 }
  0xcf   : > { %908 = vpow2.f32 %v358_v51  ;;  %v346_v55 = vrot.slane %v345_v52, 1 }
  0xd0   : > { %910 = vpow2.f32 %v360_v53  ;;  %v352_v56 = vrot.slane %v351_v54, 1 }
  0xd1   : > { %v347_v57 = vmax.f32 %v345_v52, %v346_v55 }
  0xd2   : > { %v353_v58 = vmax.f32 %v351_v54, %v352_v56 }
  0xd3   : > { %v356_v59 = vsub.f32 %v328_v36, %v347_v57 }
  0xd4   : > { %v357_v60 = vsub.f32 %v329_v40, %v353_v58 }
  0xd5   : > { %v1306_v61 = vpop.eup %908  ;;  %v362_v62 = vmul.f32 1.442695, %v356_v59 }
  0xd6   : > { %v1308_v63 = vpop.eup %910  ;;  %v366_v0 = vrot.slane %v1306_v61, 4  ;;  %v364_v1 = vmul.f32 1.442695, %v357_v60 }
  0xd7   : > { %v372_v2 = vrot.slane %v1308_v63, 4  ;;  %912 = vpow2.f32 %v362_v62 }
  0xd8   : > { %v367_v3 = vadd.f32 %v1306_v61, %v366_v0  ;;  %914 = vpow2.f32 %v364_v1 }
  0xd9   : > { %v373_v5 = vadd.f32 %v1308_v63, %v372_v2 }
  0xda   : > { %v368_v6 = vrot.slane %v367_v3, 2 }
  0xdb   : > { %v374_v7 = vrot.slane %v373_v5, 2 }
  0xdc   : > { %v369_v9 = vadd.f32 %v368_v6, %v367_v3 }
  0xdd   : > { %v1314_v10 = vpop.eup %912  ;;  %v375_v15 = vadd.f32 %v374_v7, %v373_v5 }
  0xde   : > { %v1316_v17 = vpop.eup %914  ;;  %v370_v18 = vrot.slane %v369_v9, 1  ;;  %v378_v21 = vrot.slane %v1314_v10, 4 }
  0xdf   : > { %v376_v22 = vrot.slane %v375_v15, 1  ;;  %v384_v23 = vrot.slane %v1316_v17, 4 }
  0xe0   : > { %v371_v24 = vadd.f32 %v370_v18, %v369_v9  ;;  %v379_v25 = vadd.f32 %v1314_v10, %v378_v21 }
  0xe1   : > { %v377_v26 = vadd.f32 %v376_v22, %v375_v15  ;;  %v385_v27 = vadd.f32 %v1316_v17, %v384_v23 }
  0xe2   : > { %916 = vrcp.f32 %v371_v24  ;;  %v380_v29 = vrot.slane %v379_v25, 2  ;;  %v401_v42 = vand.u32 2147483648, %v371_v24  ;;  %v399_v45 = vand.u32 2147483647, %v371_v24 }
  0xe3   : > { %918 = vrcp.f32 %v377_v26  ;;  %v386_v30 = vrot.slane %v385_v27, 2  ;;  %v416_v46 = vand.u32 2147483648, %v377_v26  ;;  %v414_v48 = vand.u32 2147483647, %v377_v26 }
  0xe4   : > { %v381_v31 = vadd.f32 %v380_v29, %v379_v25  ;;  %vm395_vm8 = vweird.f32 %v371_v24  ;;  %v402_v51 = vor.u32 1.1754944e-38, %v401_v42  ;;  %vm410_vm10 = vweird.f32 %v377_v26 }
  0xe5   : > { %v387_v32 = vadd.f32 %v386_v30, %v385_v27  ;;  %vm400_vm11 = vcmp.eq.f32.partialorder %v399_v45, 8.507059e+37  ;;  %v417_v55 = vor.u32 1.1754944e-38, %v416_v46  ;;  %vm415_vm13 = vcmp.eq.f32.partialorder %v414_v48, 8.507059e+37 }
  0xe6   : > { %v382_v33 = vrot.slane %v381_v31, 1 }
  0xe7   : > { %v388_v34 = vrot.slane %v387_v32, 1 }
  0xe8   : > { %v917_v35 = vpop.eup %916  ;;  %v383_v36 = vadd.f32 %v382_v33, %v381_v31 }
  0xe9   : > { %v919_v37 = vpop.eup %918  ;;  %v1322_v38 = vadd.f32 %v388_v34, %v387_v32  ;;  %v391_v39 = vmul.f32 %v917_v35, %v371_v24  ;;  %vm396_vm6 = vweird.f32 %v917_v35 }
  0xea   : > { %920 = vrcp.f32 %v383_v36  ;;  %v406_v40 = vmul.f32 %v919_v37, %v377_v26  ;;  %vm411_vm7 = vweird.f32 %v919_v37  ;;  %vm397_vm9 = vmor %vm395_vm8, %vm396_vm6  ;;  %v429_v2 = vand.u32 2147483647, %v383_v36 }
  0xeb   : > { %922 = vrcp.f32 %v1322_v38  ;;  %v392_v41 = vsub.f32 1.0, %v391_v39  ;;  %vm412_vm12 = vmor %vm410_vm10, %vm411_vm7  ;;  %v431_v3 = vand.u32 2147483648, %v383_v36  ;;  %v446_v9 = vand.u32 2147483648, %v1322_v38 }
  0xec   : > { %v407_v43 = vsub.f32 1.0, %v406_v40  ;;  %v444_v21 = vand.u32 2147483647, %v1322_v38  ;;  %vm425_vm0 = vweird.f32 %v383_v36  ;;  %vm440_vm3 = vweird.f32 %v1322_v38 }
  0xed   : > { %v393_v44 = vmul.f32 %v917_v35, %v392_v41  ;;  %v432_v24 = vor.u32 1.1754944e-38, %v431_v3  ;;  %vm430_vm4 = vcmp.eq.f32.partialorder %v429_v2, 8.507059e+37  ;;  %v447_v26 = vor.u32 1.1754944e-38, %v446_v9 }
  0xee   : > { %v408_v47 = vmul.f32 %v919_v37, %v407_v43  ;;  %vm445_vm6 = vcmp.eq.f32.partialorder %v444_v21, 8.507059e+37 }
  0xef   : > { %v394_v49 = vadd.f32 %v917_v35, %v393_v44 }
  0xf0   : > { %v921_v50 = vpop.eup %920  ;;  %v409_v52 = vadd.f32 %v919_v37, %v408_v47 }
  0xf1   : > { %v923_v53 = vpop.eup %922  ;;  %v398_v54 = vsel %vm397_vm9, %v917_v35, %v394_v49  ;;  %v421_v56 = vmul.f32 %v921_v50, %v383_v36  ;;  %vm426_vm14 = vweird.f32 %v921_v50 }
  0xf2   : > { %v403_v57 = vsel %vm400_vm11, %v402_v51, %v398_v54  ;;  %v413_v58 = vsel %vm412_vm12, %v919_v37, %v409_v52  ;;  %v436_v59 = vmul.f32 %v923_v53, %v1322_v38  ;;  %vm441_vm15 = vweird.f32 %v923_v53  ;;  %vm427_vm2 = vmor %vm425_vm0, %vm426_vm14 }
  0xf3   : > { %v404_v60 = vmul.f32 %v1306_v61, %v403_v57  ;;  %v418_v62 = vsel %vm415_vm13, %v417_v55, %v413_v58  ;;  %v422_v0 = vsub.f32 1.0, %v421_v56  ;;  %vm442_vm5 = vmor %vm440_vm3, %vm441_vm15 }
  0xf4   : > { %v419_v1 = vmul.f32 %v1308_v63, %v418_v62  ;;  %v437_v5 = vsub.f32 1.0, %v436_v59 }
  0xf5   : > { %v450_v6 = vmul.f32 4.0, %v404_v60  ;;  %v423_v7 = vmul.f32 %v921_v50, %v422_v0 }
  0xf6   : > { %v451_v15 = vmul.f32 4.0, %v419_v1  ;;  %v438_v18 = vmul.f32 %v923_v53, %v437_v5 }
  0xf7   : > { %v454_v22 = vmul.f32 1.442695, %v450_v6  ;;  %v424_v23 = vadd.f32 %v921_v50, %v423_v7 }
  0xf8   : > { %v456_v61 = vmul.f32 1.442695, %v451_v15  ;;  %v439_v63 = vadd.f32 %v923_v53, %v438_v18 }
  0xf9   : > { %924 = vpow2.f32 %v454_v22  ;;  %v428_v25 = vsel %vm427_vm2, %v921_v50, %v424_v23 }
  0xfa   : > { %926 = vpow2.f32 %v456_v61  ;;  %v433_v27 = vsel %vm430_vm4, %v432_v24, %v428_v25  ;;  %v443_v29 = vsel %vm442_vm5, %v923_v53, %v439_v63 }
  0xfb   : > { %v434_v30 = vmul.f32 %v1314_v10, %v433_v27  ;;  %v448_v31 = vsel %vm445_vm6, %v447_v26, %v443_v29 }
  0xfc   : > { %v449_v32 = vmul.f32 %v1316_v17, %v448_v31 }
  0xfd   : > { %v452_v33 = vmul.f32 4.0, %v434_v30 }
  0xfe   : > { %v453_v34 = vmul.f32 4.0, %v449_v32 }
  0xff   : > { %v925_v35 = vpop.eup %924  ;;  %v458_v36 = vmul.f32 1.442695, %v452_v33 }
 0x100   : > { %v927_v37 = vpop.eup %926  ;;  %v460_v38 = vmul.f32 1.442695, %v453_v34 }
 0x101   : > { %v462_v39 = vadd.f32 %v927_v37, %v925_v35  ;;  %928 = vpow2.f32 %v458_v36 }
 0x102   : > { %930 = vpow2.f32 %v460_v38 }
 0x103   : > { %463 = vadd.xlane.f32.xlu0 %v462_v39 }
 0x107   : > { %v929_v40 = vpop.eup %928 }
 0x108   : > { %v931_v41 = vpop.eup %930 }
 0x109   : > { %v465_v42 = vadd.f32 %v931_v41, %v929_v40 }
 0x10b   : > { %466 = vadd.xlane.f32.xlu0 %v465_v42 }
 0x176   : > { %v464_v43 = vpop.xlane.xlu0 %463 }
 0x177   : > { %932 = vrcp.f32 %v464_v43  ;;  %v479_v46 = vand.u32 2147483648, %v464_v43  ;;  %v477_v48 = vand.u32 2147483647, %v464_v43  ;;  %vm473_vm8 = vweird.f32 %v464_v43 }
 0x179   : > { %v480_v51 = vor.u32 1.1754944e-38, %v479_v46  ;;  %vm478_vm10 = vcmp.eq.f32.partialorder %v477_v48, 8.507059e+37 }
 0x17d   : > { %v933_v10 = vpop.eup %932 }
 0x17e   : > { %v469_v44 = vmul.f32 %v933_v10, %v464_v43  ;;  %v467_v45 = vpop.xlane.xlu0 %466  ;;  %vm474_vm7 = vweird.f32 %v933_v10 }
 0x17f   : > { %934 = vrcp.f32 %v467_v45  ;;  %vm475_vm9 = vmor %vm473_vm8, %vm474_vm7  ;;  %v495_v58 = vand.u32 2147483648, %v467_v45  ;;  %v493_v60 = vand.u32 2147483647, %v467_v45  ;;  %vm489_vm12 = vweird.f32 %v467_v45 }
 0x180   : > { %v470_v17 = vsub.f32 1.0, %v469_v44 }
 0x181   : > { %v496_v0 = vor.u32 1.1754944e-38, %v495_v58  ;;  %vm494_vm14 = vcmp.eq.f32.partialorder %v493_v60, 8.507059e+37 }
 0x182   : > { %v471_v47 = vmul.f32 %v933_v10, %v470_v17 }
 0x184   : > { %v472_v49 = vadd.f32 %v933_v10, %v471_v47 }
 0x185   : > { %v935_v50 = vpop.eup %934 }
 0x186   : > { %v476_v52 = vsel %vm475_vm9, %v933_v10, %v472_v49  ;;  %v485_v53 = vmul.f32 %v935_v50, %v467_v45  ;;  %vm490_vm11 = vweird.f32 %v935_v50 }
 0x187   : > { %v481_v54 = vsel %vm478_vm10, %v480_v51, %v476_v52  ;;  %vm491_vm13 = vmor %vm489_vm12, %vm490_vm11 }
 0x188   : > { %v482_v55 = vmul.f32 %v925_v35, %v481_v54  ;;  %v483_v56 = vmul.f32 %v927_v37, %v481_v54  ;;  %v486_v57 = vsub.f32 1.0, %v485_v53 }
 0x18a   : > { %v487_v59 = vmul.f32 %v935_v50, %v486_v57 }
 0x18c   : > { %v488_v62 = vadd.f32 %v935_v50, %v487_v59  ;;  %503 = sbr.rel (%p785_p2) target bundleno = 403 (0x193), region = 44 }
 0x18e   : > { %v492_v1 = vsel %vm491_vm13, %v935_v50, %v488_v62 }
 0x18f   : > { %v497_v2 = vsel %vm494_vm14, %v496_v0, %v492_v1 }
 0x190   : > { %v498_v3 = vmul.f32 %v929_v40, %v497_v2  ;;  %v499_v5 = vmul.f32 %v931_v41, %v497_v2 }
 0x191   : > { %504 = vst [vmem:[#allocation10] sm:$0xff] %v482_v55 }
 0x192   : > { %505 = vst [vmem:[#allocation10 + $0x8] sm:$0xff] %v483_v56 }
 0x193 PF: > { %p808_p1 = scmp.ne.s32.totalorder %s1136_s22, 1 }
 0x195   : > { %509 = sbr.rel (%p808_p1) target bundleno = 412 (0x19c), region = 48 }
 0x19a   : > { %511 = vst [vmem:[#allocation10 + $0x10] sm:$0xff] %v498_v3 }
 0x19b   : > { %512 = vst [vmem:[#allocation10 + $0x18] sm:$0xff] %v499_v5 }
 0x19c PF: > { %521 = vmatpush.bf16.xpose.msra.mxu2 %v1277_v4  ;;  %535 = vmatpush.bf16.xpose.msra.mxu3 %v1279_v8  ;;  %v552_v6 = vmul.f32 %v1286_v13, %v1286_v13  ;;  %v513_v9 = vpack.c.bf16 %v498_v3, %v482_v55  ;;  %v514_v15 = vpack.c.bf16 %v499_v5, %v483_v56  ;;  %p1354_p3 = scmp.eq.s32.totalorder %s775_s24, 1  ;;  %s1152_s7 = smov [#allocation10]   ;;  %vm651_vm12 = vcmask 1041409  }
 0x19d   : > { %v551_v18 = vmul.f32 %v1284_v12, %v1284_v12  ;;  %s680_s8 = sshll.u32 %s1152_s7, 4  ;;  %s682_s15 = sshll.u32 %s1403_s4, 4  ;;  %vm655_vm13 = vcmask 9216   ;;  %s681_s8 = int_to_ptr.vmem [resolvable:$true] %s680_s8  ;;  %s683_s15 = int_to_ptr.hbm [resolvable:$true] %s682_s15 }
 0x19e   : > { %v556_v7 = vsel %vm288_vm1, %v552_v6, 0.0  ;;  %s1153_s17 = smov 256   ;;  %s1154_s18 = smov 16  }
 0x19f   : > { %557 = vadd.xlane.f32.xlu0 %v556_v7  ;;  %v553_v4 = vsel %vm288_vm1, %v551_v18, 0.0  ;;  %830 = dma.vmem_to_hbm [thread:$0]  (%p1354_p3), %s681_s8, 512, %s683_s15, [#allocation11], %s1153_s17, %s1153_s17, %s1154_s18  }
 0x1a0   : > { %s1155_s24 = smov [#allocation9]   ;;  %s667_s28 = sshll.u32 %s1402_s3, 4  ;;  %s668_s28 = int_to_ptr.hbm [resolvable:$true] %s667_s28 }
 0x1a1   : > { %s665_s19 = sshll.u32 %s1155_s24, 4  ;;  %s666_s19 = int_to_ptr.vmem [resolvable:$true] %s665_s19 }
 0x1a4   : > { %522 = vmatpush.bf16.xpose.msra.mxu2 %v1282_v11  ;;  %536 = vmatpush.bf16.xpose.msra.mxu3 %v1289_v14 }
 0x1a7   : > { %554 = vadd.xlane.f32.xlu0 %v553_v4 }
 0x1ab   : > { %523 = vmatmul.bf16.vlgmr.msra.gmra.mxu2 %v513_v9  ;;  %537 = vmatmul.bf16.vlgmr.msra.gmra.mxu3 %v514_v15 }
 0x22e   : > { %v524_v8 = vpop.f32.mrf.mxu2  ;;  %v538_v21 = vpop.f32.mrf.mxu3 }
 0x22f   : > { %v539_v14 = vadd.f32 %v538_v21, %v524_v8 }
 0x231   : > { %v581_v26 = vmul.f32 %v539_v14, %v539_v14  ;;  %v543_v27 = vmul.f32 %v539_v14, %v1284_v12  ;;  %v558_v12 = vpop.xlane.xlu0 %557 }
 0x233   : > { %v583_v29 = vsel %vm288_vm1, %v581_v26, 0.0  ;;  %v545_v30 = vsel %vm288_vm1, %v543_v27, 0.0 }
 0x236   : > { %v526_v22 = vpop.f32.mrf.mxu2  ;;  %v540_v23 = vpop.f32.mrf.mxu3 }
 0x237   : > { %v541_v61 = vadd.f32 %v540_v23, %v526_v22 }
 0x239   : > { %v582_v24 = vmul.f32 %v541_v61, %v541_v61  ;;  %v544_v11 = vmul.f32 %v541_v61, %v1286_v13  ;;  %v560_v13 = vmax.f32 %v558_v12, 1e-16  ;;  %v555_v31 = vpop.xlane.xlu0 %554  ;;  %v640_v12 = vand.u32 127, %v253_v16 }
 0x23a   : > { %v559_v32 = vmax.f32 %v555_v31, 1e-16 }
 0x23b   : > { %v586_v63 = vsel %vm288_vm1, %v582_v24, 0.0  ;;  %v548_v25 = vsel %vm288_vm1, %v544_v11, 0.0  ;;  %936 = vrsqrt.f32 %v560_v13  ;;  %vm577_vm1 = vweird.f32 %v560_v13 }
 0x23c   : > { %587 = vadd.xlane.f32.xlu1 %v586_v63  ;;  %549 = vadd.xlane.f32.xlu2 %v548_v25  ;;  %938 = vrsqrt.f32 %v559_v32  ;;  %vm567_vm3 = vweird.f32 %v559_v32 }
 0x241   : > { %v937_v33 = vpop.eup %936 }
 0x242   : > { %v572_v34 = vmul.f32 %v937_v33, %v560_v13  ;;  %v939_v37 = vpop.eup %938  ;;  %vm578_vm15 = vweird.f32 %v937_v33 }
 0x243   : > { %v562_v40 = vmul.f32 %v939_v37, %v559_v32  ;;  %vm579_vm0 = vmor %vm577_vm1, %vm578_vm15  ;;  %vm568_vm5 = vweird.f32 %v939_v37 }
 0x244   : > { %584 = vadd.xlane.f32.xlu1 %v583_v29  ;;  %546 = vadd.xlane.f32.xlu2 %v545_v30  ;;  %v573_v35 = vmul.f32 %v937_v33, %v572_v34  ;;  %vm569_vm7 = vmor %vm567_vm3, %vm568_vm5 }
 0x245   : > { %v563_v41 = vmul.f32 %v939_v37, %v562_v40 }
 0x246   : > { %v574_v39 = vmul.f32 0.5, %v573_v35 }
 0x247   : > { %v564_v17 = vmul.f32 0.5, %v563_v41 }
 0x248   : > { %v575_v42 = vsub.f32 1.5, %v574_v39 }
 0x249   : > { %v565_v50 = vsub.f32 1.5, %v564_v17 }
 0x24a   : > { %v576_v47 = vmul.f32 %v937_v33, %v575_v42 }
 0x24b   : > { %v566_v59 = vmul.f32 %v939_v37, %v565_v50 }
 0x24c   : > { %v580_v52 = vsel %vm579_vm0, %v937_v33, %v576_v47 }
 0x24d   : > { %v570_v2 = vsel %vm569_vm7, %v939_v37, %v566_v59  ;;  %v645_v37 = vld [vmem:[#allocation9] sm:$0x3] }
 0x2af   : > { %v588_v36 = vpop.xlane.xlu1 %587  ;;  %v550_v49 = vpop.xlane.xlu2 %549 }
 0x2b0   : > { %v590_v38 = vmax.f32 %v588_v36, 1e-16  ;;  %v612_v56 = vmul.f32 %v580_v52, %v550_v49 }
 0x2b2   : > { %940 = vrsqrt.f32 %v590_v38  ;;  %vm607_vm4 = vweird.f32 %v590_v38 }
 0x2b7   : > { %v585_v43 = vpop.xlane.xlu1 %584  ;;  %v547_v3 = vpop.xlane.xlu2 %546 }
 0x2b8   : > { %v941_v10 = vpop.eup %940  ;;  %v589_v44 = vmax.f32 %v585_v43, 1e-16  ;;  %v611_v7 = vmul.f32 %v570_v2, %v547_v3 }
 0x2b9   : > { %v602_v45 = vmul.f32 %v941_v10, %v590_v38  ;;  %vm608_vm2 = vweird.f32 %v941_v10 }
 0x2ba   : > { %942 = vrsqrt.f32 %v589_v44  ;;  %vm609_vm6 = vmor %vm607_vm4, %vm608_vm2  ;;  %vm597_vm9 = vweird.f32 %v589_v44 }
 0x2bb   : > { %v603_v46 = vmul.f32 %v941_v10, %v602_v45 }
 0x2bd   : > { %v604_v48 = vmul.f32 0.5, %v603_v46 }
 0x2bf   : > { %v605_v51 = vsub.f32 1.5, %v604_v48 }
 0x2c0   : > { %v943_v53 = vpop.eup %942 }
 0x2c1   : > { %v606_v54 = vmul.f32 %v941_v10, %v605_v51  ;;  %v592_v55 = vmul.f32 %v943_v53, %v589_v44  ;;  %vm598_vm8 = vweird.f32 %v943_v53 }
 0x2c2   : > { %vm599_vm10 = vmor %vm597_vm9, %vm598_vm8 }
 0x2c3   : > { %v610_v57 = vsel %vm609_vm6, %v941_v10, %v606_v54  ;;  %v593_v58 = vmul.f32 %v943_v53, %v592_v55 }
 0x2c4   : > { %v614_v60 = vmul.f32 %v612_v56, %v610_v57 }
 0x2c5   : > { %v594_v62 = vmul.f32 0.5, %v593_v58 }
 0x2c6   : > { %v616_v0 = vmul.f32 5.0, %v614_v60 }
 0x2c7   : > { %v595_v1 = vsub.f32 1.5, %v594_v62 }
 0x2c8   : > { %v619_v5 = vmul.f32 1.442695, %v616_v0 }
 0x2c9   : > { %v596_v6 = vmul.f32 %v943_v53, %v595_v1 }
 0x2ca   : > { %944 = vpow2.f32 %v619_v5 }
 0x2cb   : > { %v600_v9 = vsel %vm599_vm10, %v943_v53, %v596_v6 }
 0x2cc   : > { %v613_v15 = vmul.f32 %v611_v7, %v600_v9 }
 0x2ce   : > { %v615_v18 = vmul.f32 5.0, %v613_v15 }
 0x2d0   : > { %v945_v4 = vpop.eup %944  ;;  %v617_v8 = vmul.f32 1.442695, %v615_v18 }
 0x2d1   : > { %v622_v21 = vmul.f32 %v945_v4, %v1303_v28  ;;  %v641_v28 = vstv %s1136_s22 }
 0x2d2   : > { %946 = vpow2.f32 %v617_v8  ;;  %vm642_vm11 = vcmp.eq.s32.totalorder %v640_v12, %v641_v28 }
 0x2d3   : > { %v629_v22 = vrot.slane %v622_v21, 4  ;;  %v809_v34 = vsel %vm642_vm11, 1.0, %v1151_v19 }
 0x2d5   : > { %v630_v23 = vadd.f32 %v629_v22, %v622_v21 }
 0x2d7   : > { %v631_v61 = vrot.slane %v630_v23, 2 }
 0x2d8   : > { %v947_v24 = vpop.eup %946 }
 0x2d9   : > { %v632_v11 = vadd.f32 %v631_v61, %v630_v23  ;;  %v621_v14 = vmul.f32 %v947_v24, %v1299_v20 }
 0x2db   : > { %v633_v63 = vrot.slane %v632_v11, 1  ;;  %v623_v25 = vrot.slane %v621_v14, 4 }
 0x2dd   : > { %v634_v26 = vadd.f32 %v633_v63, %v632_v11  ;;  %v624_v27 = vadd.f32 %v623_v25, %v621_v14 }
 0x2df   : > { %948 = vlog2.f32 %v634_v26  ;;  %v625_v29 = vrot.slane %v624_v27, 2 }
 0x2e1   : > { %v626_v30 = vadd.f32 %v625_v29, %v624_v27 }
 0x2e3   : > { %v627_v13 = vrot.slane %v626_v30, 1 }
 0x2e5   : > { %v949_v31 = vpop.eup %948  ;;  %v628_v32 = vadd.f32 %v627_v13, %v626_v30 }
 0x2e6   : > { %v638_v33 = vmul.f32 0.6931472, %v949_v31 }
 0x2e7   : > { %950 = vlog2.f32 %v628_v32 }
 0x2e8   : > { %v647_v35 = vmul.f32 %v809_v34, %v638_v33 }
 0x2ea   : > { %v650_v39 = vrot.slane %v647_v35, 7 }
 0x2ed   : > { %v951_v20 = vpop.eup %950 }
 0x2ee   : > { %v636_v36 = vmul.f32 0.6931472, %v951_v20 }
 0x2f0   : > { %v646_v38 = vmul.f32 %v809_v34, %v636_v36 }
 0x2f2   : > { %v652_v16 = vsel %vm651_vm12, %v650_v39, %v646_v38 }
 0x2f3   : > { %v654_v40 = vadd.f32 %v652_v16, %v645_v37 }
 0x2f5   : > { %656 = vst.msk [vmem:[#allocation9] sm:$0x3] %vm655_vm13, %v654_v40 }
 0x2f6   : > { %828 = dma.vmem_to_hbm [thread:$0]  (%p1354_p3), %s666_s19, 32, %s668_s28, [#allocation6]  }
 0x2f7   : > { %1115 = dma.done.wait (%p1354_p3), [#allocation6], 32  }
 0x2f8   : > { %1117 = vsyncadd (%p1354_p3), [#allocation6], 4294967264 }
 0x2f9   : > { %1119 = dma.done.wait (%p1354_p3), [#allocation11], 512  }
 0x2fa   : > { %1121 = vsyncadd (%p1354_p3), [#allocation11], 4294966784 }
 0x2fb PF: > { %s29_s23 = sadd.s32 1, %s1144_s23   ;;  %s1409_s19 = smov %s1128_s20 }
 0x2fc   : > { %p26_p4 = scmp.ge.s32.totalorder %s29_s23, 4   ;;  %s1410_s20 = smov %s1132_s21 }
 0x2fd   : > { %s1411_s21 = smov %s1256_s16  ;;  %s1412_s22 = smov %s1140_s0 }
 0x2fe   : > { %s1413_s0 = smov %s1415_s9  ;;  %28 = sbr.rel (!%p26_p4) target bundleno = 13 (0xd), region = 94 }
 0x303   :  { %704 = vsyncpa [#allocation5], 1 }
 0x304   :  { %706 = vsyncpa [#allocation5 + $0x1], 1 }
 0x305   :  { %707 = vsyncpa [#allocation8], 1 }
 0x306   :  { %709 = vsyncpa [#allocation8 + $0x1], 1 }
 0x307   :  { %710 = vsyncpa [#allocation6], 1 }
 0x308   :  { %712 = vsyncpa [#allocation6 + $0x1], 1 }
 0x309   :  { %713 = vsyncpa [#allocation11], 1 }

</bundles_post_ra>
